<compile_context>
chip_gen: v6e
topology: v6e:2x2x1
jax: 0.10.0
libtpu: 0.0.40
codegen_flags: <defaults>
</compile_context>

<pallas_src>
import functools

import jax
import jax.numpy as jnp
from jax.experimental import pallas as pl
from jax.experimental.pallas import tpu as pltpu

# Module hyper-parameters (from the PyTorch script)
INPUT_SIZE = 4
HIDDEN_SIZE = 4
BATCH_SIZE = 1
NUM_LAYERS = 2  # the fused wavefront weight below is specialized to 2 layers
SEQ_LEN = 8     # small sequence length for the example input


def rnn_kernel(x_ref, wih0_ref, b0_ref, wbig_ref, b1_ref, out_ref, *,
               batch, seq_len, hidden):
    """Fused 2-layer tanh RNN over the whole sequence in a single kernel call.

    x_ref    : (T*B, I)   sequence-major rows (B consecutive rows per timestep)
    wih0_ref : (I, H)     layer-0 input weights (transposed for x @ W)
    b0_ref   : (1, H)     layer-0 combined bias  (b_ih0 + b_hh0)
    wbig_ref : (2H, 2H)   fused wavefront weight [[W_hh1^T, 0], [W_ih1^T, W_hh0^T]]
    b1_ref   : (1, H)     layer-1 combined bias  (b_ih1 + b_hh1)
    out_ref  : (T*B, H)   layer-1 hidden state per timestep
    """
    B, T, H = batch, seq_len, hidden

    # ---- Prologue (off the recurrent chain) --------------------------------
    # Layer-0 input projection for ALL timesteps in one MXU pass.
    x_proj = (
        jnp.dot(x_ref[...], wih0_ref[...], preferred_element_type=jnp.float32)
        + b0_ref[...]
    )  # (T*B, H)

    w_big = wbig_ref[...]                                # loop-invariant, in vregs
    b1 = jnp.broadcast_to(b1_ref[...], (B, H))           # broadcast hoisted once
    zeros = jnp.zeros((B, H), jnp.float32)

    # Per-wave additive constants c_w = [b1 | x_proj_w] (layer-1 lanes first).
    #   wave 0   : layer-1 half must be 0 so the (unused) h1_{-1} slot stays 0
    #   wave T   : no x_T exists; layer-0 half is garbage/unused -> 0
    c = []
    for w in range(T + 1):
        xp = x_proj[w * B:(w + 1) * B, :] if w < T else zeros
        bb = b1 if w >= 1 else zeros
        c.append(jnp.concatenate([bb, xp], axis=1))      # (B, 2H)

    # ---- Wavefront recurrence ----------------------------------------------
    #   v_w     = [h1_{w-2} | h0_{w-1}]      (v_0 == 0)
    #   v_{w+1} = tanh(v_w @ W_big + c_w)  = [h1_{w-1} | h0_w]
    # One dot + one add + one tanh per wave on the serial dependency chain.
    v = jnp.tanh(c[0])                                    # wave 0: v_0 @ W_big == 0
    for w in range(1, T + 1):
        v = jnp.tanh(
            jnp.dot(v, w_big, preferred_element_type=jnp.float32) + c[w]
        )
        # h1_{w-1} is ready in the first H lanes: fire-and-forget row store,
        # nothing downstream reads it, so it does not lengthen the chain.
        out_ref[(w - 1) * B:w * B, :] = v[:, :H].astype(out_ref.dtype)


def rnn_forward(x, w_ih0, w_hh0, b_ih0, b_hh0, w_ih1, w_hh1, b_ih1, b_hh1):
    """2-layer tanh RNN forward.  Weights in PyTorch nn.RNN convention:
       w_ih0: (H, I), w_hh0: (H, H), w_ih1: (H, H), w_hh1: (H, H), biases: (H,)."""
    T, B, I = x.shape
    H = w_hh0.shape[0]

    # Sequence-major flatten: rows [t*B:(t+1)*B] are timestep t (cheap XLA view).
    x2d = x.reshape(T * B, I)

    # Final fused / padding-friendly parameter forms (built once, outside the kernel).
    wih0_t = w_ih0.T.astype(jnp.float32)                      # (I, H)  for  x @ W
    b0 = (b_ih0 + b_hh0).reshape(1, H).astype(jnp.float32)    # layer-0 combined bias
    b1 = (b_ih1 + b_hh1).reshape(1, H).astype(jnp.float32)    # layer-1 combined bias
    zeros_hh = jnp.zeros((H, H), jnp.float32)
    w_big = jnp.block([[w_hh1.T, zeros_hh],
                       [w_ih1.T, w_hh0.T]]).astype(jnp.float32)  # (2H, 2H)

    kernel = functools.partial(rnn_kernel, batch=B, seq_len=T, hidden=H)
    vmem = pl.BlockSpec(memory_space=pltpu.MemorySpace.VMEM)
    out = pl.pallas_call(
        kernel,
        out_shape=jax.ShapeDtypeStruct((T * B, H), jnp.float32),
        in_specs=[vmem, vmem, vmem, vmem, vmem],
        out_specs=vmem,
    )(x2d, wih0_t, b0, w_big, b1)
    # Already the equivalent of out.view(-1, hidden_size).
    return out


def rnn_reference(x, w_ih0, w_hh0, b_ih0, b_hh0, w_ih1, w_hh1, b_ih1, b_hh1):
    """Pure-JAX reference with torch.nn.RNN semantics (for a correctness check)."""
    T, B, _ = x.shape
    H = w_hh0.shape[0]
    layers = [(w_ih0, w_hh0, b_ih0, b_hh0), (w_ih1, w_hh1, b_ih1, b_hh1)]
    h = [jnp.zeros((B, H), jnp.float32) for _ in layers]
    outs = []
    for t in range(T):
        inp = x[t]
        for l, (w_ih, w_hh, b_ih, b_hh) in enumerate(layers):
            h_new = jnp.tanh(inp @ w_ih.T + h[l] @ w_hh.T + b_ih + b_hh)
            h[l] = h_new
            inp = h_new
        outs.append(inp)
    return jnp.stack(outs, axis=0).reshape(-1, H)


if __name__ == "__main__":
    key = jax.random.PRNGKey(0)
    (k_x, k_wih0, k_whh0, k_bih0, k_bhh0,
     k_wih1, k_whh1, k_bih1, k_bhh1) = jax.random.split(key, 9)

    bound = 1.0 / jnp.sqrt(HIDDEN_SIZE)  # torch.nn.RNN default init range

    # Example input: (seq_len, batch, input_size) — PyTorch batch_first=False layout.
    x = jax.random.normal(k_x, (SEQ_LEN, BATCH_SIZE, INPUT_SIZE), dtype=jnp.float32)

    # Parameters in PyTorch nn.RNN convention.
    w_ih0 = jax.random.uniform(k_wih0, (HIDDEN_SIZE, INPUT_SIZE), jnp.float32, -bound, bound)
    w_hh0 = jax.random.uniform(k_whh0, (HIDDEN_SIZE, HIDDEN_SIZE), jnp.float32, -bound, bound)
    b_ih0 = jax.random.uniform(k_bih0, (HIDDEN_SIZE,), jnp.float32, -bound, bound)
    b_hh0 = jax.random.uniform(k_bhh0, (HIDDEN_SIZE,), jnp.float32, -bound, bound)
    w_ih1 = jax.random.uniform(k_wih1, (HIDDEN_SIZE, HIDDEN_SIZE), jnp.float32, -bound, bound)
    w_hh1 = jax.random.uniform(k_whh1, (HIDDEN_SIZE, HIDDEN_SIZE), jnp.float32, -bound, bound)
    b_ih1 = jax.random.uniform(k_bih1, (HIDDEN_SIZE,), jnp.float32, -bound, bound)
    b_hh1 = jax.random.uniform(k_bhh1, (HIDDEN_SIZE,), jnp.float32, -bound, bound)

    out = rnn_forward(x, w_ih0, w_hh0, b_ih0, b_hh0, w_ih1, w_hh1, b_ih1, b_hh1)
    jax.block_until_ready(out)

    ref = rnn_reference(x, w_ih0, w_hh0, b_ih0, b_hh0, w_ih1, w_hh1, b_ih1, b_hh1)
    assert out.shape == (SEQ_LEN * BATCH_SIZE, HIDDEN_SIZE)
    assert jnp.allclose(out, ref, atol=1e-5, rtol=1e-5)

    # TODO(synk): if multiple independent sequences are available, pack them along the
    # batch dimension (free up to 8 rows of f32 sublanes) to amortize the pallas_call
    # overhead that dominates at B=1, H=4.

    print("KERNEL_OK")
</pallas_src>

<mosaic_0001>
module attributes {stable_mosaic.version = 11 : i64} {
  func.func @rnn_kernel(%arg0: memref<8x4xf32, #tpu.memory_space<vmem>>, %arg1: memref<4x4xf32, #tpu.memory_space<vmem>>, %arg2: memref<1x4xf32, #tpu.memory_space<vmem>>, %arg3: memref<8x8xf32, #tpu.memory_space<vmem>>, %arg4: memref<1x4xf32, #tpu.memory_space<vmem>>, %arg5: memref<8x4xf32, #tpu.memory_space<vmem>>) attributes {dimension_semantics = [], scalar_prefetch = 0 : i64, scratch_operands = 0 : i64, tpu.core_type = #tpu.core_type<tc>} {
    %c0 = arith.constant 0 : index
    %c0_0 = arith.constant 0 : index
    %0 = vector.load %arg0[%c0, %c0_0] : memref<8x4xf32, #tpu.memory_space<vmem>>, vector<8x4xf32>
    %c0_1 = arith.constant 0 : index
    %c0_2 = arith.constant 0 : index
    %1 = vector.load %arg1[%c0_1, %c0_2] : memref<4x4xf32, #tpu.memory_space<vmem>>, vector<4x4xf32>
    %cst = arith.constant dense<0.000000e+00> : vector<8x4xf32>
    %2 = tpu.matmul %0, %1, %cst {dimension_numbers = #tpu.dot_dimension_numbers<[1], [0], [0], [1], [0, 0, 1, 1], [], []>} : vector<8x4xf32>, vector<4x4xf32>, vector<8x4xf32> -> vector<8x4xf32>
    %c0_3 = arith.constant 0 : index
    %c0_4 = arith.constant 0 : index
    %3 = vector.load %arg2[%c0_3, %c0_4] : memref<1x4xf32, #tpu.memory_space<vmem>>, vector<1x4xf32>
    %4 = vector.broadcast %3 : vector<1x4xf32> to vector<8x4xf32>
    %5 = arith.addf %2, %4 : vector<8x4xf32>
    %c0_5 = arith.constant 0 : index
    %c0_6 = arith.constant 0 : index
    %6 = vector.load %arg3[%c0_5, %c0_6] : memref<8x8xf32, #tpu.memory_space<vmem>>, vector<8x8xf32>
    %c0_7 = arith.constant 0 : index
    %c0_8 = arith.constant 0 : index
    %7 = vector.load %arg4[%c0_7, %c0_8] : memref<1x4xf32, #tpu.memory_space<vmem>>, vector<1x4xf32>
    %cst_9 = arith.constant 0.000000e+00 : f32
    %8 = vector.broadcast %cst_9 : f32 to vector<1x4xf32>
    %9 = vector.extract_strided_slice %5 {offsets = [0, 0], sizes = [1, 4], strides = [1, 1]} : vector<8x4xf32> to vector<1x4xf32>
    %10 = tpu.concatenate %8, %9 in 1 : vector<1x4xf32>, vector<1x4xf32> -> vector<1x8xf32>
    %11 = vector.extract_strided_slice %5 {offsets = [1, 0], sizes = [1, 4], strides = [1, 1]} : vector<8x4xf32> to vector<1x4xf32>
    %12 = tpu.concatenate %7, %11 in 1 : vector<1x4xf32>, vector<1x4xf32> -> vector<1x8xf32>
    %13 = vector.extract_strided_slice %5 {offsets = [2, 0], sizes = [1, 4], strides = [1, 1]} : vector<8x4xf32> to vector<1x4xf32>
    %14 = tpu.concatenate %7, %13 in 1 : vector<1x4xf32>, vector<1x4xf32> -> vector<1x8xf32>
    %15 = vector.extract_strided_slice %5 {offsets = [3, 0], sizes = [1, 4], strides = [1, 1]} : vector<8x4xf32> to vector<1x4xf32>
    %16 = tpu.concatenate %7, %15 in 1 : vector<1x4xf32>, vector<1x4xf32> -> vector<1x8xf32>
    %17 = vector.extract_strided_slice %5 {offsets = [4, 0], sizes = [1, 4], strides = [1, 1]} : vector<8x4xf32> to vector<1x4xf32>
    %18 = tpu.concatenate %7, %17 in 1 : vector<1x4xf32>, vector<1x4xf32> -> vector<1x8xf32>
    %19 = vector.extract_strided_slice %5 {offsets = [5, 0], sizes = [1, 4], strides = [1, 1]} : vector<8x4xf32> to vector<1x4xf32>
    %20 = tpu.concatenate %7, %19 in 1 : vector<1x4xf32>, vector<1x4xf32> -> vector<1x8xf32>
    %21 = vector.extract_strided_slice %5 {offsets = [6, 0], sizes = [1, 4], strides = [1, 1]} : vector<8x4xf32> to vector<1x4xf32>
    %22 = tpu.concatenate %7, %21 in 1 : vector<1x4xf32>, vector<1x4xf32> -> vector<1x8xf32>
    %23 = vector.extract_strided_slice %5 {offsets = [7, 0], sizes = [1, 4], strides = [1, 1]} : vector<8x4xf32> to vector<1x4xf32>
    %24 = tpu.concatenate %7, %23 in 1 : vector<1x4xf32>, vector<1x4xf32> -> vector<1x8xf32>
    %25 = tpu.concatenate %7, %8 in 1 : vector<1x4xf32>, vector<1x4xf32> -> vector<1x8xf32>
    %26 = math.tanh %10 : vector<1x8xf32>
    %cst_10 = arith.constant dense<0.000000e+00> : vector<1x8xf32>
    %27 = tpu.matmul %26, %6, %cst_10 {dimension_numbers = #tpu.dot_dimension_numbers<[1], [0], [0], [1], [0, 0, 1, 1], [], []>} : vector<1x8xf32>, vector<8x8xf32>, vector<1x8xf32> -> vector<1x8xf32>
    %28 = arith.addf %27, %12 : vector<1x8xf32>
    %29 = math.tanh %28 : vector<1x8xf32>
    %30 = vector.extract_strided_slice %29 {offsets = [0, 0], sizes = [1, 4], strides = [1, 1]} : vector<1x8xf32> to vector<1x4xf32>
    %c0_11 = arith.constant 0 : index
    %c0_12 = arith.constant 0 : index
    %31 = vector.load %arg5[%c0_11, %c0_12] : memref<8x4xf32, #tpu.memory_space<vmem>>, vector<1x4xf32>
    tpu.vector_store %arg5[%c0_11, %c0_12], %30 {strides = array<i32>} : memref<8x4xf32, #tpu.memory_space<vmem>>, vector<1x4xf32>,
    %cst_13 = arith.constant dense<0.000000e+00> : vector<1x8xf32>
    %32 = tpu.matmul %29, %6, %cst_13 {dimension_numbers = #tpu.dot_dimension_numbers<[1], [0], [0], [1], [0, 0, 1, 1], [], []>} : vector<1x8xf32>, vector<8x8xf32>, vector<1x8xf32> -> vector<1x8xf32>
    %33 = arith.addf %32, %14 : vector<1x8xf32>
    %34 = math.tanh %33 : vector<1x8xf32>
    %35 = vector.extract_strided_slice %34 {offsets = [0, 0], sizes = [1, 4], strides = [1, 1]} : vector<1x8xf32> to vector<1x4xf32>
    %c1 = arith.constant 1 : index
    %c0_14 = arith.constant 0 : index
    %36 = vector.load %arg5[%c1, %c0_14] : memref<8x4xf32, #tpu.memory_space<vmem>>, vector<1x4xf32>
    tpu.vector_store %arg5[%c1, %c0_14], %35 {strides = array<i32>} : memref<8x4xf32, #tpu.memory_space<vmem>>, vector<1x4xf32>,
    %cst_15 = arith.constant dense<0.000000e+00> : vector<1x8xf32>
    %37 = tpu.matmul %34, %6, %cst_15 {dimension_numbers = #tpu.dot_dimension_numbers<[1], [0], [0], [1], [0, 0, 1, 1], [], []>} : vector<1x8xf32>, vector<8x8xf32>, vector<1x8xf32> -> vector<1x8xf32>
    %38 = arith.addf %37, %16 : vector<1x8xf32>
    %39 = math.tanh %38 : vector<1x8xf32>
    %40 = vector.extract_strided_slice %39 {offsets = [0, 0], sizes = [1, 4], strides = [1, 1]} : vector<1x8xf32> to vector<1x4xf32>
    %c2 = arith.constant 2 : index
    %c0_16 = arith.constant 0 : index
    %41 = vector.load %arg5[%c2, %c0_16] : memref<8x4xf32, #tpu.memory_space<vmem>>, vector<1x4xf32>
    tpu.vector_store %arg5[%c2, %c0_16], %40 {strides = array<i32>} : memref<8x4xf32, #tpu.memory_space<vmem>>, vector<1x4xf32>,
    %cst_17 = arith.constant dense<0.000000e+00> : vector<1x8xf32>
    %42 = tpu.matmul %39, %6, %cst_17 {dimension_numbers = #tpu.dot_dimension_numbers<[1], [0], [0], [1], [0, 0, 1, 1], [], []>} : vector<1x8xf32>, vector<8x8xf32>, vector<1x8xf32> -> vector<1x8xf32>
    %43 = arith.addf %42, %18 : vector<1x8xf32>
    %44 = math.tanh %43 : vector<1x8xf32>
    %45 = vector.extract_strided_slice %44 {offsets = [0, 0], sizes = [1, 4], strides = [1, 1]} : vector<1x8xf32> to vector<1x4xf32>
    %c3 = arith.constant 3 : index
    %c0_18 = arith.constant 0 : index
    %46 = vector.load %arg5[%c3, %c0_18] : memref<8x4xf32, #tpu.memory_space<vmem>>, vector<1x4xf32>
    tpu.vector_store %arg5[%c3, %c0_18], %45 {strides = array<i32>} : memref<8x4xf32, #tpu.memory_space<vmem>>, vector<1x4xf32>,
    %cst_19 = arith.constant dense<0.000000e+00> : vector<1x8xf32>
    %47 = tpu.matmul %44, %6, %cst_19 {dimension_numbers = #tpu.dot_dimension_numbers<[1], [0], [0], [1], [0, 0, 1, 1], [], []>} : vector<1x8xf32>, vector<8x8xf32>, vector<1x8xf32> -> vector<1x8xf32>
    %48 = arith.addf %47, %20 : vector<1x8xf32>
    %49 = math.tanh %48 : vector<1x8xf32>
    %50 = vector.extract_strided_slice %49 {offsets = [0, 0], sizes = [1, 4], strides = [1, 1]} : vector<1x8xf32> to vector<1x4xf32>
    %c4 = arith.constant 4 : index
    %c0_20 = arith.constant 0 : index
    %51 = vector.load %arg5[%c4, %c0_20] : memref<8x4xf32, #tpu.memory_space<vmem>>, vector<1x4xf32>
    tpu.vector_store %arg5[%c4, %c0_20], %50 {strides = array<i32>} : memref<8x4xf32, #tpu.memory_space<vmem>>, vector<1x4xf32>,
    %cst_21 = arith.constant dense<0.000000e+00> : vector<1x8xf32>
    %52 = tpu.matmul %49, %6, %cst_21 {dimension_numbers = #tpu.dot_dimension_numbers<[1], [0], [0], [1], [0, 0, 1, 1], [], []>} : vector<1x8xf32>, vector<8x8xf32>, vector<1x8xf32> -> vector<1x8xf32>
    %53 = arith.addf %52, %22 : vector<1x8xf32>
    %54 = math.tanh %53 : vector<1x8xf32>
    %55 = vector.extract_strided_slice %54 {offsets = [0, 0], sizes = [1, 4], strides = [1, 1]} : vector<1x8xf32> to vector<1x4xf32>
    %c5 = arith.constant 5 : index
    %c0_22 = arith.constant 0 : index
    %56 = vector.load %arg5[%c5, %c0_22] : memref<8x4xf32, #tpu.memory_space<vmem>>, vector<1x4xf32>
    tpu.vector_store %arg5[%c5, %c0_22], %55 {strides = array<i32>} : memref<8x4xf32, #tpu.memory_space<vmem>>, vector<1x4xf32>,
    %cst_23 = arith.constant dense<0.000000e+00> : vector<1x8xf32>
    %57 = tpu.matmul %54, %6, %cst_23 {dimension_numbers = #tpu.dot_dimension_numbers<[1], [0], [0], [1], [0, 0, 1, 1], [], []>} : vector<1x8xf32>, vector<8x8xf32>, vector<1x8xf32> -> vector<1x8xf32>
    %58 = arith.addf %57, %24 : vector<1x8xf32>
    %59 = math.tanh %58 : vector<1x8xf32>
    %60 = vector.extract_strided_slice %59 {offsets = [0, 0], sizes = [1, 4], strides = [1, 1]} : vector<1x8xf32> to vector<1x4xf32>
    %c6 = arith.constant 6 : index
    %c0_24 = arith.constant 0 : index
    %61 = vector.load %arg5[%c6, %c0_24] : memref<8x4xf32, #tpu.memory_space<vmem>>, vector<1x4xf32>
    tpu.vector_store %arg5[%c6, %c0_24], %60 {strides = array<i32>} : memref<8x4xf32, #tpu.memory_space<vmem>>, vector<1x4xf32>,
    %cst_25 = arith.constant dense<0.000000e+00> : vector<1x8xf32>
    %62 = tpu.matmul %59, %6, %cst_25 {dimension_numbers = #tpu.dot_dimension_numbers<[1], [0], [0], [1], [0, 0, 1, 1], [], []>} : vector<1x8xf32>, vector<8x8xf32>, vector<1x8xf32> -> vector<1x8xf32>
    %63 = arith.addf %62, %25 : vector<1x8xf32>
    %64 = math.tanh %63 : vector<1x8xf32>
    %65 = vector.extract_strided_slice %64 {offsets = [0, 0], sizes = [1, 4], strides = [1, 1]} : vector<1x8xf32> to vector<1x4xf32>
    %c7 = arith.constant 7 : index
    %c0_26 = arith.constant 0 : index
    %66 = vector.load %arg5[%c7, %c0_26] : memref<8x4xf32, #tpu.memory_space<vmem>>, vector<1x4xf32>
    tpu.vector_store %arg5[%c7, %c0_26], %65 {strides = array<i32>} : memref<8x4xf32, #tpu.memory_space<vmem>>, vector<1x4xf32>,
    return
  }
}

</mosaic_0001>

<bundles_post_ra>
// kernel: tpu_custom_call.1
= control target key start
LH: loop header
LB: loop body
LE: loop exit
PB: predicated region body
PF: predicated region fallthrough
CT: control target
= control target key end

     0   :  { %vm33_vm0 = vcmask 1043456   ;;  %vm29_vm1 = vcmask 31744   ;;  %v852_v0 = vmov 0.0   ;;  %vm853_vm2 = vmmov 0   ;;  %s997_s1 = inlined_call_operand.vmem [shape: f32[4,4], index: 1, kind: input, shape index: {}]   ;;  %s998_s0 = inlined_call_operand.vmem [shape: f32[8,4], index: 0, kind: input, shape index: {}]   ;;  %s999_s2 = inlined_call_operand.vmem [shape: f32[1,4], index: 2, kind: input, shape index: {}]   ;;  %s1000_s3 = inlined_call_operand.vmem [shape: f32[8,8], index: 3, kind: input, shape index: {}]   ;;  %s1001_s4 = inlined_call_operand.vmem [shape: f32[1,4], index: 4, kind: input, shape index: {}]   ;;  %s1002_s5 = inlined_call_operand.vmem [shape: f32[8,4], index: 5, kind: output, shape index: {}]  }
   0x1   :  { %786 = vmatprep.subr.mxu0 %v852_v0  ;;  %v21_v1 = vld [vmem:[%s997_s1] sm:$0xf]  ;;  %788 = vmatprep.mubr.msk.f32.mxu0 %vm853_vm2, %v852_v0  ;;  %vm151_vm3 = vcmask 64512   ;;  %vm226_vm4 = vcmask 24576  }
   0x2   :  { %v20_v2 = vld [vmem:[%s998_s0] sm:$0xff]  ;;  %787 = vmatpush3.msk.msra.mxu0 %vm33_vm0, %v21_v1  ;;  %791 = vmatprep.subr.mxu1 %v852_v0  ;;  %s854_s0 = smov 4  }
   0x3   :  { %789 = vmatmul.mubr.msk.f32.vlgmr.msra.gmra.mxu0 %vm29_vm1, %v20_v2  ;;  %793 = vmatprep.mubr.msk.f32.mxu1 %vm853_vm2, %v852_v0  ;;  %v757_v3 = vld [vmem:[%s999_s2] ss:$0 sm:$0xff] }
   0x4   :  { %796 = vmatprep.subr.mxu0 %v852_v0  ;;  %798 = vmatprep.mubr.msk.f32.mxu0 %vm853_vm2, %v852_v0  ;;  %v907_v8 = vld [vmem:[%s1000_s3] sm:$0xff] }
   0x5   :  { %792 = vmatpush3.msra.mxu1 %v907_v8  ;;  %797 = vmatpush3.msra.mxu0 %v907_v8  ;;  %v922_v19 = vld [vmem:[%s1001_s4] sm:$0x1] }
   0x6   :  { %801 = vmatprep.subr.mxu1 %v852_v0  ;;  %806 = vmatprep.subr.mxu0 %v852_v0  ;;  %v149_v61 = vsel %vm29_vm1, %v922_v19, 0.0 }
  0xc3   :  { %v103_v4 = vpop.f32.mrf.mxu0 }
  0xc4   :  { %v104_v5 = vadd.f32 %v757_v3, %v103_v4 }
  0xc5   :  { %v790_v6 = vpop.f32.mrf.mxu0 }
  0xc6   :  { %110 = vrot.lane.b32.xlu0 %v104_v5, %s854_s0  ;;  %v119_v7 = vrot.slane %v104_v5, 2  ;;  %v114_v9 = vrot.slane %v104_v5, 1  ;;  %v124_v10 = vrot.slane %v104_v5, 3  ;;  %v129_v11 = vrot.slane %v104_v5, 4 }
  0xc7   :  { %v134_v12 = vrot.slane %v104_v5, 5  ;;  %v139_v13 = vrot.slane %v104_v5, 6  ;;  %v144_v14 = vrot.slane %v104_v5, 7 }
  0xc8   :  { %120 = vrot.lane.b32.xlu1 %v119_v7, %s854_s0 }
  0xca   :  { %115 = vrot.lane.b32.xlu0 %v114_v9, %s854_s0 }
  0xcc   :  { %125 = vrot.lane.b32.xlu1 %v124_v10, %s854_s0 }
  0xce   :  { %130 = vrot.lane.b32.xlu0 %v129_v11, %s854_s0 }
  0xd0   :  { %135 = vrot.lane.b32.xlu1 %v134_v12, %s854_s0 }
  0xd2   :  { %140 = vrot.lane.b32.xlu0 %v139_v13, %s854_s0 }
  0xd4   :  { %145 = vrot.lane.b32.xlu1 %v144_v14, %s854_s0 }
 0x138   :  { %v111_v15 = vpop.permute.xlu0 %110 }
 0x139   :  { %v113_v16 = vsel %vm29_vm1, 0.0, %v111_v15 }
 0x13a   :  { %834 = vtanh.f32 %v113_v16  ;;  %v121_v25 = vpop.permute.xlu1 %120 }
 0x13b   :  { %v123_v26 = vsel %vm29_vm1, %v922_v19, %v121_v25 }
 0x13c   :  { %v116_v18 = vpop.permute.xlu0 %115 }
 0x13d   :  { %v118_v20 = vsel %vm29_vm1, %v922_v19, %v116_v18 }
 0x13e   :  { %v126_v31 = vpop.permute.xlu1 %125 }
 0x13f   :  { %v128_v32 = vsel %vm29_vm1, %v922_v19, %v126_v31 }
 0x140   :  { %v131_v37 = vpop.permute.xlu0 %130 }
 0x141   :  { %v133_v38 = vsel %vm29_vm1, %v922_v19, %v131_v37 }
 0x142   :  { %v136_v43 = vpop.permute.xlu1 %135 }
 0x143   :  { %v138_v44 = vsel %vm29_vm1, %v922_v19, %v136_v43 }
 0x144   :  { %v141_v49 = vpop.permute.xlu0 %140 }
 0x145   :  { %v143_v50 = vsel %vm29_vm1, %v922_v19, %v141_v49 }
 0x146   :  { %v146_v55 = vpop.permute.xlu1 %145 }
 0x147   :  { %v835_v17 = vpop.eup %834  ;;  %v148_v56 = vsel %vm29_vm1, %v922_v19, %v146_v55 }
 0x148   :  { %794 = vmatmul.mubr.msk.f32.vlgmr.msra.gmra.mxu1 %vm151_vm3, %v835_v17 }
 0x149   :  { %802 = vmatpush3.msra.mxu1 %v907_v8  ;;  %803 = vmatprep.mubr.msk.f32.mxu1 %vm853_vm2, %v852_v0 }
 0x14a   :  { %811 = vmatprep.subr.mxu1 %v852_v0 }
 0x208   :  { %v221_v21 = vpop.f32.mrf.mxu1 }
 0x209   :  { %v222_v22 = vadd.f32 %v221_v21, %v118_v20 }
 0x20a   :  { %v795_v23 = vpop.f32.mrf.mxu1 }
 0x20b   :  { %836 = vtanh.f32 %v222_v22 }
 0x218   :  { %v837_v24 = vpop.eup %836 }
 0x219   :  { %227 = vst.msk [vmem:[%s1002_s5] sm:$0x1] %vm226_vm4, %v837_v24  ;;  %799 = vmatmul.mubr.msk.f32.vlgmr.msra.gmra.mxu0 %vm151_vm3, %v837_v24 }
 0x21a   :  { %807 = vmatpush3.msra.mxu0 %v907_v8  ;;  %808 = vmatprep.mubr.msk.f32.mxu0 %vm853_vm2, %v852_v0 }
 0x21b   :  { %816 = vmatprep.subr.mxu0 %v852_v0 }
 0x2d9   :  { %v297_v27 = vpop.f32.mrf.mxu0 }
 0x2da   :  { %v298_v28 = vadd.f32 %v297_v27, %v123_v26 }
 0x2db   :  { %v800_v29 = vpop.f32.mrf.mxu0 }
 0x2dc   :  { %838 = vtanh.f32 %v298_v28 }
 0x2e9   :  { %v839_v30 = vpop.eup %838 }
 0x2ea   :  { %302 = vst.msk [vmem:[%s1002_s5 + $0x1] sm:$0x1] %vm226_vm4, %v839_v30  ;;  %804 = vmatmul.mubr.msk.f32.vlgmr.msra.gmra.mxu1 %vm151_vm3, %v839_v30 }
 0x2eb   :  { %812 = vmatpush3.msra.mxu1 %v907_v8  ;;  %813 = vmatprep.mubr.msk.f32.mxu1 %vm853_vm2, %v852_v0 }
 0x2ec   :  { %821 = vmatprep.subr.mxu1 %v852_v0 }
 0x3aa   :  { %v372_v33 = vpop.f32.mrf.mxu1 }
 0x3ab   :  { %v373_v34 = vadd.f32 %v372_v33, %v128_v32 }
 0x3ac   :  { %v805_v35 = vpop.f32.mrf.mxu1 }
 0x3ad   :  { %840 = vtanh.f32 %v373_v34 }
 0x3ba   :  { %v841_v36 = vpop.eup %840 }
 0x3bb   :  { %377 = vst.msk [vmem:[%s1002_s5 + $0x2] sm:$0x1] %vm226_vm4, %v841_v36  ;;  %809 = vmatmul.mubr.msk.f32.vlgmr.msra.gmra.mxu0 %vm151_vm3, %v841_v36 }
 0x3bc   :  { %817 = vmatpush3.msra.mxu0 %v907_v8  ;;  %818 = vmatprep.mubr.msk.f32.mxu0 %vm853_vm2, %v852_v0 }
 0x3bd   :  { %826 = vmatprep.subr.mxu0 %v852_v0 }
 0x47b   :  { %v447_v39 = vpop.f32.mrf.mxu0 }
 0x47c   :  { %v448_v40 = vadd.f32 %v447_v39, %v133_v38 }
 0x47d   :  { %v810_v41 = vpop.f32.mrf.mxu0 }
 0x47e   :  { %842 = vtanh.f32 %v448_v40 }
 0x48b   :  { %v843_v42 = vpop.eup %842 }
 0x48c   :  { %452 = vst.msk [vmem:[%s1002_s5 + $0x3] sm:$0x1] %vm226_vm4, %v843_v42  ;;  %814 = vmatmul.mubr.msk.f32.vlgmr.msra.gmra.mxu1 %vm151_vm3, %v843_v42 }
 0x48d   :  { %822 = vmatpush3.msra.mxu1 %v907_v8  ;;  %823 = vmatprep.mubr.msk.f32.mxu1 %vm853_vm2, %v852_v0 }
 0x54c   :  { %v522_v45 = vpop.f32.mrf.mxu1 }
 0x54d   :  { %v523_v46 = vadd.f32 %v522_v45, %v138_v44 }
 0x54e   :  { %v815_v47 = vpop.f32.mrf.mxu1 }
 0x54f   :  { %844 = vtanh.f32 %v523_v46 }
 0x55c   :  { %v845_v48 = vpop.eup %844 }
 0x55d   :  { %527 = vst.msk [vmem:[%s1002_s5 + $0x4] sm:$0x1] %vm226_vm4, %v845_v48  ;;  %819 = vmatmul.mubr.msk.f32.vlgmr.msra.gmra.mxu0 %vm151_vm3, %v845_v48 }
 0x55e   :  { %827 = vmatpush3.msra.mxu0 %v907_v8  ;;  %828 = vmatprep.mubr.msk.f32.mxu0 %vm853_vm2, %v852_v0 }
 0x61d   :  { %v597_v51 = vpop.f32.mrf.mxu0 }
 0x61e   :  { %v598_v52 = vadd.f32 %v597_v51, %v143_v50 }
 0x61f   :  { %v820_v53 = vpop.f32.mrf.mxu0 }
 0x620   :  { %846 = vtanh.f32 %v598_v52 }
 0x62d   :  { %v847_v54 = vpop.eup %846 }
 0x62e   :  { %602 = vst.msk [vmem:[%s1002_s5 + $0x5] sm:$0x1] %vm226_vm4, %v847_v54  ;;  %824 = vmatmul.mubr.msk.f32.vlgmr.msra.gmra.mxu1 %vm151_vm3, %v847_v54 }
 0x6ee   :  { %v672_v57 = vpop.f32.mrf.mxu1 }
 0x6ef   :  { %v673_v58 = vadd.f32 %v672_v57, %v148_v56 }
 0x6f0   :  { %v825_v59 = vpop.f32.mrf.mxu1 }
 0x6f1   :  { %848 = vtanh.f32 %v673_v58 }
 0x6fe   :  { %v849_v60 = vpop.eup %848 }
 0x6ff   :  { %677 = vst.msk [vmem:[%s1002_s5 + $0x6] sm:$0x1] %vm226_vm4, %v849_v60  ;;  %829 = vmatmul.mubr.msk.f32.vlgmr.msra.gmra.mxu0 %vm151_vm3, %v849_v60 }
 0x7bf   :  { %v747_v62 = vpop.f32.mrf.mxu0 }
 0x7c0   :  { %v748_v63 = vadd.f32 %v747_v62, %v149_v61 }
 0x7c1   :  { %v830_v0 = vpop.f32.mrf.mxu0 }
 0x7c2   :  { %850 = vtanh.f32 %v748_v63 }
 0x7cf   :  { %v851_v1 = vpop.eup %850 }
 0x7d0   :  { %752 = vst.msk [vmem:[%s1002_s5 + $0x7] sm:$0x1] %vm226_vm4, %v851_v1 }

</bundles_post_ra>
